<compile_context>
chip_gen: v7x
topology: tpu7x:2x2x1
jax: 0.10.0
libtpu: 0.0.40
codegen_flags: <defaults>
</compile_context>

<pallas_src>
import math
import functools

import jax
import jax.numpy as jnp
from jax.experimental import pallas as pl
from jax.experimental.pallas import tpu as pltpu

LANE = 128      # lane width (last dim tiling)
SUBLANE = 8     # f32 sublane granularity (second-to-last dim)


def _round_up(x, m):
    return ((x + m - 1) // m) * m


def _matmul_kernel(x_ref, w_ref, o_ref):
    # x_ref: (tm, Kp) row tile, w_ref: (Kp, Np) full weight (VMEM-resident),
    # o_ref: (tm, Np) output tile. MXU matmul, f32 accumulation.
    o_ref[...] = jnp.dot(
        x_ref[...], w_ref[...], preferred_element_type=jnp.float32
    ).astype(o_ref.dtype)


def _padded_matmul(x, w, out_dtype, tm):
    """x: [Mp, Kp], w: [Kp, Np] — already padded lane/sublane dense."""
    Mp, Kp = x.shape
    _, Np = w.shape
    grid = (Mp // tm,)

    flops = 2 * Mp * Kp * Np
    bytes_accessed = (
        Mp * Kp * x.dtype.itemsize
        + Kp * Np * w.dtype.itemsize
        + Mp * Np * jnp.dtype(out_dtype).itemsize
    )

    return pl.pallas_call(
        _matmul_kernel,
        out_shape=jax.ShapeDtypeStruct((Mp, Np), out_dtype),
        grid=grid,
        in_specs=[
            # row tile of the fused X
            pl.BlockSpec((tm, Kp), lambda i: (i, 0)),
            # full weight; constant index_map → DMA'd once, resident in VMEM
            pl.BlockSpec((Kp, Np), lambda i: (0, 0)),
        ],
        out_specs=pl.BlockSpec((tm, Np), lambda i: (i, 0)),
        compiler_params=pltpu.CompilerParams(
            dimension_semantics=("parallel",),  # row axis shards across TCs (v7x)
        ),
        cost_estimate=pl.CostEstimate(
            flops=flops, transcendentals=0, bytes_accessed=bytes_accessed
        ),
    )(x, w)


@functools.partial(jax.jit, static_argnames=("compute_dtype", "max_tm"))
def fused_embed(X, weight, *, compute_dtype=jnp.bfloat16, max_tm=512):
    """Fused X[dty] @ weight for every dty in one Pallas launch.

    X:      dict of [num_nodes_dty, in_ft] arrays
    weight: [in_ft, out_ft]
    returns dict of [num_nodes_dty, out_ft] arrays (weight dtype, f32).
    """
    keys = list(X.keys())
    sizes = [X[k].shape[0] for k in keys]
    in_ft, out_ft = weight.shape
    out_dtype = weight.dtype

    # lane-dense padding of the contraction / output dims
    Kp = _round_up(in_ft, LANE)
    Np = _round_up(out_ft, LANE)

    # row tiling: single block when everything fits in one reasonable tile,
    # otherwise 512-row tiles (re-budget max_tm for v7x's 64 MiB VMEM if
    # Kp/Np ever grow into the thousands).
    M_total = sum(sizes)
    if M_total <= max_tm:
        tm = _round_up(max(M_total, SUBLANE), SUBLANE)
    else:
        tm = max_tm
    Mp = _round_up(M_total, tm)

    # concatenate all node-type matrices, cast to the MXU compute dtype,
    # zero-pad rows to the tile multiple and K to the lane multiple.
    x_cat = jnp.concatenate([X[k].astype(compute_dtype) for k in keys], axis=0)
    x_pad = jnp.pad(x_cat, ((0, Mp - M_total), (0, Kp - in_ft)))
    w_pad = jnp.pad(
        weight.astype(compute_dtype), ((0, Kp - in_ft), (0, Np - out_ft))
    )

    out_full = _padded_matmul(x_pad, w_pad, out_dtype, tm)

    # slice the fused output back into the per-dty dict (drops row/col padding)
    outs = {}
    off = 0
    for k, m in zip(keys, sizes):
        outs[k] = out_full[off:off + m, :out_ft]
        off += m
    return outs


class EmbedLayer:
    """JAX/Pallas port of DualHGCN.Embed_layer."""

    def __init__(self, in_ft, out_ft, dty_nets, key,
                 compute_dtype=jnp.bfloat16):
        stdv = 1.0 / math.sqrt(out_ft)
        # deterministic analogue of weight.data.uniform_(-stdv, stdv)
        self.weight = jax.random.uniform(
            key, (in_ft, out_ft), dtype=jnp.float32, minval=-stdv, maxval=stdv
        )
        self.dty_nets = dty_nets
        self.compute_dtype = compute_dtype

    def __call__(self, X):
        # only the dtys this layer owns, in dty_nets order (matches PyTorch loop)
        X_in = {dty: X[dty] for dty in self.dty_nets}
        return fused_embed(X_in, self.weight, compute_dtype=self.compute_dtype)


if __name__ == "__main__":
    key = jax.random.PRNGKey(0)
    k_w, k_u, k_v, k_uv = jax.random.split(key, 4)

    in_ft, out_ft = 32, 32
    dty_nets = ["u", "v", "uv"]

    # per-type node feature matrices (num_nodes x in_ft)
    X = {
        "u": jax.random.normal(k_u, (16, in_ft), dtype=jnp.float32),
        "v": jax.random.normal(k_v, (24, in_ft), dtype=jnp.float32),
        "uv": jax.random.normal(k_uv, (8, in_ft), dtype=jnp.float32),
    }

    layer = EmbedLayer(in_ft, out_ft, dty_nets, k_w)
    out = layer(X)
    out = jax.tree_util.tree_map(jax.block_until_ready, out)

    # correctness checks
    w = layer.weight
    w_bf = w.astype(jnp.bfloat16).astype(jnp.float32)
    for dty in dty_nets:
        assert out[dty].shape == (X[dty].shape[0], out_ft)
        # tight check against the bf16-rounded-input reference (same compute path)
        ref_bf = X[dty].astype(jnp.bfloat16).astype(jnp.float32) @ w_bf
        assert jnp.allclose(out[dty], ref_bf, atol=1e-4, rtol=1e-4)
        # loose check against the exact f32 reference (bf16 input rounding only)
        ref_f32 = X[dty] @ w
        assert jnp.allclose(out[dty], ref_f32, atol=5e-2, rtol=5e-2)

    print("KERNEL_OK")
</pallas_src>

<mosaic_0001>
module attributes {stable_mosaic.version = 11 : i64} {
  func.func @_matmul_kernel(%arg0: i32, %arg1: memref<48x128xbf16, #tpu.memory_space<vmem>>, %arg2: memref<128x128xbf16, #tpu.memory_space<vmem>>, %arg3: memref<48x128xf32, #tpu.memory_space<vmem>>) attributes {dimension_semantics = [#tpu.dimension_semantics<parallel>], iteration_bounds = array<i64: 1>, scalar_prefetch = 0 : i64, scratch_operands = 0 : i64, tpu.core_type = #tpu.core_type<tc>, window_params = [{transform_indices = @transform_0, window_bounds = array<i64: 48, 128>}, {pipeline_mode = #tpu.pipeline_mode<synchronous>, transform_indices = @transform_1, window_bounds = array<i64: 128, 128>}, {transform_indices = @transform_2, window_bounds = array<i64: 48, 128>}]} {
    %c0 = arith.constant 0 : index
    %c0_0 = arith.constant 0 : index
    %0 = vector.load %arg1[%c0, %c0_0] : memref<48x128xbf16, #tpu.memory_space<vmem>>, vector<48x128xbf16>
    %c0_1 = arith.constant 0 : index
    %c0_2 = arith.constant 0 : index
    %1 = vector.load %arg2[%c0_1, %c0_2] : memref<128x128xbf16, #tpu.memory_space<vmem>>, vector<128x128xbf16>
    %cst = arith.constant dense<0.000000e+00> : vector<48x128xf32>
    %2 = tpu.matmul %0, %1, %cst {dimension_numbers = #tpu.dot_dimension_numbers<[1], [0], [0], [1], [0, 0, 1, 1], [], []>} : vector<48x128xbf16>, vector<128x128xbf16>, vector<48x128xf32> -> vector<48x128xf32>
    %c0_3 = arith.constant 0 : index
    %c0_4 = arith.constant 0 : index
    %3 = vector.load %arg3[%c0_3, %c0_4] : memref<48x128xf32, #tpu.memory_space<vmem>>, vector<48x128xf32>
    tpu.vector_store %arg3[%c0_3, %c0_4], %2 {strides = array<i32>} : memref<48x128xf32, #tpu.memory_space<vmem>>, vector<48x128xf32>,
    return
  }
  func.func @transform_0(%arg0: i32) -> (i32, i32) {
    %c0_i32 = arith.constant 0 : i32
    %c0_i32_0 = arith.constant 0 : i32
    return %arg0, %c0_i32 : i32, i32
  }
  func.func @transform_1(%arg0: i32) -> (i32, i32) {
    %c0_i32 = arith.constant 0 : i32
    %c0_i32_0 = arith.constant 0 : i32
    %c0_i32_1 = arith.constant 0 : i32
    return %c0_i32, %c0_i32_0 : i32, i32
  }
  func.func @transform_2(%arg0: i32) -> (i32, i32) {
    %c0_i32 = arith.constant 0 : i32
    %c0_i32_0 = arith.constant 0 : i32
    return %arg0, %c0_i32 : i32, i32
  }
}

</mosaic_0001>

<bundles_post_ra>
// kernel: fused_embed.1
= control target key start
LH: loop header
LB: loop body
LE: loop exit
PB: predicated region body
PF: predicated region fallthrough
CT: control target
= control target key end

     0   :  { %v246_v0 = vmov 0.0   ;;  %vm247_vm0 = vmmov 0   ;;  %s317_s1 = inlined_call_operand.vmem [shape: bf16[128,128], index: 1, kind: input, shape index: {}]   ;;  %s318_s0 = inlined_call_operand.vmem [shape: bf16[48,128], index: 0, kind: input, shape index: {}]   ;;  %s319_s2 = inlined_call_operand.vmem [shape: f32[48,128], index: 2, kind: output, shape index: {}]  }
   0x1   :  { %217 = vmatprep.subr.bf16.mxu1 %v246_v0  ;;  %v235_v1 = vld [vmem:[%s317_s1] sm:$0xff]   ;;  %189 = vmatprep.subr.bf16.mxu0 %v246_v0  ;;  %v236_v2 = vld [vmem:[%s317_s1 + $0x8] sm:$0xff]   ;;  %v237_v3 = vld [vmem:[%s317_s1 + $0x10] sm:$0xff]  }
   0x2   :  { %209 = vmatprep.mubr.msk.bf16.mxu1 %vm247_vm0, %v246_v0  ;;  %205 = vmatprep.mubr.msk.bf16.mxu0 %vm247_vm0, %v246_v0  ;;  %v238_v4 = vld [vmem:[%s317_s1 + $0x18] sm:$0xff]   ;;  %v239_v5 = vld [vmem:[%s317_s1 + $0x20] sm:$0xff]   ;;  %v240_v6 = vld [vmem:[%s317_s1 + $0x28] sm:$0xff]  }
   0x3   :  { %225 = vmatpush3.bf16.msra.mxu1 %v235_v1  ;;  %190 = vmatpush3.bf16.msra.mxu0 %v235_v1  ;;  %v241_v7 = vld [vmem:[%s317_s1 + $0x30] sm:$0xff]   ;;  %v242_v8 = vld [vmem:[%s317_s1 + $0x38] sm:$0xff]   ;;  %v243_v9 = vld [vmem:[%s318_s0 + $0x8] sm:$0xff]  }
   0x4   :  { %218 = vmatprep.subr.bf16.mxu1 %v246_v0  ;;  %191 = vmatprep.subr.bf16.mxu0 %v246_v0  ;;  %v244_v10 = vld [vmem:[%s318_s0] sm:$0xff]   ;;  %v245_v11 = vld [vmem:[%s318_s0 + $0x10] sm:$0xff]  }
   0x7   :  { %226 = vmatpush3.bf16.msra.mxu1 %v236_v2  ;;  %192 = vmatpush3.bf16.msra.mxu0 %v236_v2 }
   0x8   :  { %219 = vmatprep.subr.bf16.mxu1 %v246_v0  ;;  %193 = vmatprep.subr.bf16.mxu0 %v246_v0 }
   0xb   :  { %227 = vmatpush3.bf16.msra.mxu1 %v237_v3  ;;  %194 = vmatpush3.bf16.msra.mxu0 %v237_v3 }
   0xc   :  { %220 = vmatprep.subr.bf16.mxu1 %v246_v0  ;;  %195 = vmatprep.subr.bf16.mxu0 %v246_v0 }
   0xf   :  { %228 = vmatpush3.bf16.msra.mxu1 %v238_v4  ;;  %196 = vmatpush3.bf16.msra.mxu0 %v238_v4 }
  0x10   :  { %221 = vmatprep.subr.bf16.mxu1 %v246_v0  ;;  %197 = vmatprep.subr.bf16.mxu0 %v246_v0 }
  0x13   :  { %229 = vmatpush3.bf16.msra.mxu1 %v239_v5  ;;  %198 = vmatpush3.bf16.msra.mxu0 %v239_v5 }
  0x14   :  { %222 = vmatprep.subr.bf16.mxu1 %v246_v0  ;;  %199 = vmatprep.subr.bf16.mxu0 %v246_v0 }
  0x17   :  { %230 = vmatpush3.bf16.msra.mxu1 %v240_v6  ;;  %200 = vmatpush3.bf16.msra.mxu0 %v240_v6 }
  0x18   :  { %223 = vmatprep.subr.bf16.mxu1 %v246_v0  ;;  %201 = vmatprep.subr.bf16.mxu0 %v246_v0 }
  0x1b   :  { %231 = vmatpush3.bf16.msra.mxu1 %v241_v7  ;;  %202 = vmatpush3.bf16.msra.mxu0 %v241_v7 }
  0x1c   :  { %224 = vmatprep.subr.bf16.mxu1 %v246_v0  ;;  %203 = vmatprep.subr.bf16.mxu0 %v246_v0 }
  0x1f   :  { %232 = vmatpush3.bf16.msra.mxu1 %v242_v8  ;;  %204 = vmatpush3.bf16.msra.mxu0 %v242_v8 }
  0x22   :  { %210 = vmatmul.mubr.bf16.vlgmr.msra.gmra.mrb[0].mxu1 %v243_v9  ;;  %206 = vmatmul.mubr.bf16.vlgmr.msra.gmra.mrb[0].mxu0 %v244_v10 }
  0x23   :  { %213 = vmatprep.mubr.msk.bf16.mxu1 %vm247_vm0, %v246_v0 }
  0x2a   :  { %214 = vmatmul.mubr.bf16.gmra.mrb[4].mxu1 %v245_v11 }
  0xf5   :  { %v142_v12 = vpop.f32.mrb[0].mxu1  ;;  %v134_v13 = vpop.f32.mrb[0].mxu0 }
  0xf6   :  { %159 = vst [vmem:[%s319_s2 + $0x10] sm:$0xff] %v142_v12  ;;  %v211_v14 = vpop.f32.mrb[1].mxu1  ;;  %157 = vst [vmem:[%s319_s2] sm:$0xff] %v134_v13  ;;  %v207_v15 = vpop.f32.mrb[1].mxu0 }
  0xf7   :  { %v145_v16 = vpop.f32.mrb[2].mxu1  ;;  %v137_v17 = vpop.f32.mrb[2].mxu0 }
  0xf8   :  { %160 = vst [vmem:[%s319_s2 + $0x18] sm:$0xff] %v145_v16  ;;  %v212_v18 = vpop.f32.mrb[3].mxu1  ;;  %158 = vst [vmem:[%s319_s2 + $0x8] sm:$0xff] %v137_v17  ;;  %v208_v19 = vpop.f32.mrb[3].mxu0 }
  0xfd   :  { %v150_v20 = vpop.f32.mrb[4].mxu1 }
  0xfe   :  { %161 = vst [vmem:[%s319_s2 + $0x20] sm:$0xff] %v150_v20  ;;  %v215_v21 = vpop.f32.mrb[5].mxu1 }
  0xff   :  { %v153_v22 = vpop.f32.mrb[6].mxu1 }
 0x100   :  { %162 = vst [vmem:[%s319_s2 + $0x28] sm:$0xff] %v153_v22  ;;  %v216_v23 = vpop.f32.mrb[7].mxu1 }

</bundles_post_ra>
